<compile_context>
chip_gen: v5e
topology: v5e:2x2
jax: 0.10.0
libtpu: 0.0.40
codegen_flags: <defaults>
</compile_context>

<pallas_src>
import functools

import jax
import jax.numpy as jnp
from jax import lax
from jax.experimental import pallas as pl
from jax.experimental.pallas import tpu as pltpu

_EPS = 1e-8  # matches torch.nn.functional.cosine_similarity default eps


def _cosine_loss_kernel(x_ref, y_ref, o_ref, *, hw, tile):
    # x_ref, y_ref: (Bt, C, tile) blocks of the (B, C, HW) inputs.
    # o_ref:        (1, 1, 8, 128) lane-dense per-block partial-sum slab.
    x = x_ref[...].astype(jnp.float32)             # (Bt, C, tile)
    y = y_ref[...].astype(jnp.float32)             # (Bt, C, tile)

    dot = jnp.sum(x * y, axis=1)                   # (Bt, tile)
    sx = jnp.sum(x * x, axis=1)                    # (Bt, tile)
    sy = jnp.sum(y * y, axis=1)                    # (Bt, tile)

    eps2 = jnp.float32(_EPS * _EPS)
    # Clamping the squared sums to eps^2 == clamping each norm to eps
    # (per-norm eps semantics, matches the pure-JAX reference below);
    # rsqrt goes to the EUP slot.
    cos = (dot
           * lax.rsqrt(jnp.maximum(sx, eps2))
           * lax.rsqrt(jnp.maximum(sy, eps2)))     # (Bt, tile)

    if hw % tile:  # static check: mask padded lane columns of the last tile
        col = pl.program_id(1) * tile + lax.broadcasted_iota(
            jnp.int32, cos.shape, 1)
        cos = jnp.where(col < hw, cos, jnp.float32(0.0))

    partial = jnp.sum(cos)  # scalar partial for this (batch-block, lane-tile)

    # Place the scalar at element (0, 0) of an (8, 128) slab, zeros elsewhere,
    # so the wrapper can reduce all partials with a single jnp.sum.
    row = lax.broadcasted_iota(jnp.int32, (8, 128), 0)
    lane = lax.broadcasted_iota(jnp.int32, (8, 128), 1)
    slab = jnp.where((row == 0) & (lane == 0), partial, jnp.float32(0.0))
    o_ref[...] = slab.reshape(1, 1, 8, 128)


def _vmem_budget(itemsize):
    """Generation-aware (vmem_limit_bytes, per-operand block-byte budget)."""
    mib = 1024 * 1024
    try:
        cap = int(getattr(pltpu.get_tpu_info(), "vmem_capacity_bytes", 64 * mib))
    except Exception:  # can't query -> assume the tightest generation (v7x)
        cap = 64 * mib
    if cap >= 96 * mib:          # v5e / v6e: 128 MiB physical VMEM
        limit, block = 64 * mib, 6 * mib
    else:                        # v7x: 64 MiB VMEM per TensorCore
        limit, block = 48 * mib, 3 * mib
    if itemsize < 4:             # bf16/fp8 inputs are widened to f32 in-kernel
        block //= 2
    return limit, block


def _pick_block(b, c, hw, itemsize, max_block_bytes, *, min_steps=4):
    """Choose (bt, tile): each grid step covers bt batches x full C x tile lanes."""
    row_bytes = max(1, c * itemsize)  # bytes of one lane column for one batch

    # Lane tile: largest multiple of 128 whose single-batch block fits the
    # budget (no artificial 2048 cap any more), without exceeding the array.
    tile = max(128, (max_block_bytes // row_bytes) // 128 * 128)
    hw_floor = max(128, (hw // 128) * 128)   # keep block <= array when possible
    tile = min(tile, hw_floor)
    t_steps = pl.cdiv(hw, tile)

    # Batch blocking: if one batch's lanes fit with lots of room to spare
    # (tiny C*HW), fold several batches into each block to amortize the
    # ~600-cycle per-step overhead.  bt always divides B (no batch padding).
    bt = 1
    if t_steps == 1:
        bt = min(b, max(1, max_block_bytes // (row_bytes * tile)))
        while b % bt:
            bt -= 1

    # Keep >= min_steps grid steps when possible so both of v7x's TensorCores
    # get work (both grid axes are "parallel").
    while bt > 1 and (b // bt) * t_steps < min_steps:
        bt -= 1
        while b % bt:
            bt -= 1
    if bt == 1 and b * t_steps < min_steps and tile > 128:
        want_t = -(-min_steps // b)                       # ceil(min_steps / b)
        tile_cap = max(128, ((-(-hw // want_t)) + 127) // 128 * 128)
        tile = min(tile, tile_cap)
        t_steps = pl.cdiv(hw, tile)

    return bt, tile


def cosine_loss(x, y):
    """Pallas implementation of CosineLoss.forward for NCHW inputs."""
    assert x.shape == y.shape and x.ndim == 4
    B, C, H, W = x.shape
    HW = H * W
    N = B * HW

    # (B, C, H, W) -> (B, C, H*W): contiguous reshape, no HBM traffic.
    xr = x.reshape(B, C, HW)
    yr = y.reshape(B, C, HW)

    vmem_limit, block_budget = _vmem_budget(x.dtype.itemsize)
    Bt, tile = _pick_block(B, C, HW, x.dtype.itemsize, block_budget)
    G = B // Bt                      # batch-block grid extent
    T = pl.cdiv(HW, tile)            # lane-tile grid extent

    kernel = functools.partial(_cosine_loss_kernel, hw=HW, tile=tile)

    partials = pl.pallas_call(
        kernel,
        out_shape=jax.ShapeDtypeStruct((G, T, 8, 128), jnp.float32),
        grid=(G, T),
        in_specs=[
            pl.BlockSpec((Bt, C, tile), lambda b, t: (b, 0, t)),
            pl.BlockSpec((Bt, C, tile), lambda b, t: (b, 0, t)),
        ],
        out_specs=pl.BlockSpec((1, 1, 8, 128), lambda b, t: (b, t, 0, 0)),
        compiler_params=pltpu.CompilerParams(
            dimension_semantics=("parallel", "parallel"),
            vmem_limit_bytes=vmem_limit,
        ),
    )(xr, yr)

    # "+1" per valid spatial position hoisted out of the kernel.
    return jnp.sum(partials) + jnp.float32(N)


def cosine_loss_ref(x, y):
    """Pure-JAX reference matching torch.cosine_similarity(dim=1)."""
    xf = x.astype(jnp.float32)
    yf = y.astype(jnp.float32)
    dot = jnp.sum(xf * yf, axis=1)
    nx = jnp.sqrt(jnp.sum(xf * xf, axis=1))
    ny = jnp.sqrt(jnp.sum(yf * yf, axis=1))
    cos = dot / (jnp.maximum(nx, _EPS) * jnp.maximum(ny, _EPS))
    return jnp.sum(cos + 1.0)


if __name__ == "__main__":
    key = jax.random.PRNGKey(0)
    kx, ky = jax.random.split(key)

    # Primary shape (NCHW): exact lane tiling.
    B, C, H, W = 2, 4, 16, 16
    x = jax.random.normal(kx, (B, C, H, W), dtype=jnp.float32)
    y = jax.random.normal(ky, (B, C, H, W), dtype=jnp.float32)
    loss = jax.block_until_ready(cosine_loss(x, y))
    ref = jax.block_until_ready(cosine_loss_ref(x, y))
    assert jnp.allclose(loss, ref, rtol=1e-5, atol=1e-5), (loss, ref)

    # Ragged shape: exercises the in-kernel mask on the last lane tile.
    x2 = jax.random.normal(kx, (2, 3, 9, 15), dtype=jnp.float32)
    y2 = jax.random.normal(ky, (2, 3, 9, 15), dtype=jnp.float32)
    loss2 = jax.block_until_ready(cosine_loss(x2, y2))
    ref2 = jax.block_until_ready(cosine_loss_ref(x2, y2))
    assert jnp.allclose(loss2, ref2, rtol=1e-5, atol=1e-5), (loss2, ref2)

    # Larger batch with tiny C*HW: exercises the batch-blocking path (Bt > 1).
    x3 = jax.random.normal(kx, (16, 4, 16, 16), dtype=jnp.float32)
    y3 = jax.random.normal(ky, (16, 4, 16, 16), dtype=jnp.float32)
    loss3 = jax.block_until_ready(cosine_loss(x3, y3))
    ref3 = jax.block_until_ready(cosine_loss_ref(x3, y3))
    assert jnp.allclose(loss3, ref3, rtol=1e-5, atol=1e-5), (loss3, ref3)

    print("KERNEL_OK")
</pallas_src>

<mosaic_0001>
module attributes {stable_mosaic.version = 11 : i64} {
  func.func @_cosine_loss_kernel(%arg0: i32, %arg1: i32, %arg2: memref<1x4x128xf32, #tpu.memory_space<vmem>>, %arg3: memref<1x4x128xf32, #tpu.memory_space<vmem>>, %arg4: memref<1x1x8x128xf32, #tpu.memory_space<vmem>>) attributes {dimension_semantics = [#tpu.dimension_semantics<parallel>, #tpu.dimension_semantics<parallel>], iteration_bounds = array<i64: 2, 2>, scalar_prefetch = 0 : i64, scratch_operands = 0 : i64, tpu.core_type = #tpu.core_type<tc>, window_params = [{transform_indices = @transform_0, window_bounds = array<i64: 1, 4, 128>}, {transform_indices = @transform_1, window_bounds = array<i64: 1, 4, 128>}, {transform_indices = @transform_2, window_bounds = array<i64: 1, 1, 8, 128>}]} {
    %c0 = arith.constant 0 : index
    %c0_0 = arith.constant 0 : index
    %c0_1 = arith.constant 0 : index
    %0 = vector.load %arg2[%c0, %c0_0, %c0_1] : memref<1x4x128xf32, #tpu.memory_space<vmem>>, vector<1x4x128xf32>
    %c0_2 = arith.constant 0 : index
    %c0_3 = arith.constant 0 : index
    %c0_4 = arith.constant 0 : index
    %1 = vector.load %arg3[%c0_2, %c0_3, %c0_4] : memref<1x4x128xf32, #tpu.memory_space<vmem>>, vector<1x4x128xf32>
    %2 = arith.mulf %0, %1 : vector<1x4x128xf32>
    %cst = arith.constant dense<0.000000e+00> : vector<1x128xf32>
    %3 = vector.multi_reduction <add>, %2, %cst [1] : vector<1x4x128xf32> to vector<1x128xf32>
    %4 = arith.mulf %0, %0 : vector<1x4x128xf32>
    %cst_5 = arith.constant dense<0.000000e+00> : vector<1x128xf32>
    %5 = vector.multi_reduction <add>, %4, %cst_5 [1] : vector<1x4x128xf32> to vector<1x128xf32>
    %6 = arith.mulf %1, %1 : vector<1x4x128xf32>
    %cst_6 = arith.constant dense<0.000000e+00> : vector<1x128xf32>
    %7 = vector.multi_reduction <add>, %6, %cst_6 [1] : vector<1x4x128xf32> to vector<1x128xf32>
    %cst_7 = arith.constant 1.000000e-16 : f32
    %8 = vector.broadcast %cst_7 : f32 to vector<1x128xf32>
    %9 = arith.maximumf %5, %8 : vector<1x128xf32>
    %10 = math.rsqrt %9 : vector<1x128xf32>
    %11 = arith.mulf %3, %10 : vector<1x128xf32>
    %cst_8 = arith.constant 1.000000e-16 : f32
    %12 = vector.broadcast %cst_8 : f32 to vector<1x128xf32>
    %13 = arith.maximumf %7, %12 : vector<1x128xf32>
    %14 = math.rsqrt %13 : vector<1x128xf32>
    %15 = arith.mulf %11, %14 : vector<1x128xf32>
    %16 = vector.shape_cast %15 : vector<1x128xf32> to vector<1x1x128xf32>
    %cst_9 = arith.constant dense<0.000000e+00> : vector<1xf32>
    %17 = vector.multi_reduction <add>, %16, %cst_9 [1, 2] : vector<1x1x128xf32> to vector<1xf32>
    %18 = vector.shape_cast %17 : vector<1xf32> to vector<1x1x1xf32>
    %19 = vector.extract %18[0, 0, 0] : f32 from vector<1x1x1xf32>
    %20 = tpu.iota {dimensions = array<i32: 0>} : vector<8x128xi32>
    %21 = tpu.iota {dimensions = array<i32: 1>} : vector<8x128xi32>
    %c0_i32 = arith.constant 0 : i32
    %22 = vector.broadcast %c0_i32 : i32 to vector<8x128xi32>
    %23 = arith.cmpi eq, %20, %22 : vector<8x128xi32>
    %c0_i32_10 = arith.constant 0 : i32
    %24 = vector.broadcast %c0_i32_10 : i32 to vector<8x128xi32>
    %25 = arith.cmpi eq, %21, %24 : vector<8x128xi32>
    %26 = arith.andi %23, %25 : vector<8x128xi1>
    %cst_11 = arith.constant 0.000000e+00 : f32
    %27 = vector.broadcast %19 : f32 to vector<8x128xf32>
    %28 = vector.broadcast %cst_11 : f32 to vector<8x128xf32>
    %29 = arith.select %26, %27, %28 : vector<8x128xi1>, vector<8x128xf32>
    %30 = vector.shape_cast %29 : vector<8x128xf32> to vector<1x1x8x128xf32>
    %c0_12 = arith.constant 0 : index
    %c0_13 = arith.constant 0 : index
    %c0_14 = arith.constant 0 : index
    %c0_15 = arith.constant 0 : index
    %31 = vector.load %arg4[%c0_12, %c0_13, %c0_14, %c0_15] : memref<1x1x8x128xf32, #tpu.memory_space<vmem>>, vector<1x1x8x128xf32>
    tpu.vector_store %arg4[%c0_12, %c0_13, %c0_14, %c0_15], %30 {strides = array<i32>} : memref<1x1x8x128xf32, #tpu.memory_space<vmem>>, vector<1x1x8x128xf32>,
    return
  }
  func.func @transform_0(%arg0: i32, %arg1: i32) -> (i32, i32, i32) {
    %c0_i32 = arith.constant 0 : i32
    %c0_i32_0 = arith.constant 0 : i32
    return %arg0, %c0_i32, %arg1 : i32, i32, i32
  }
  func.func @transform_1(%arg0: i32, %arg1: i32) -> (i32, i32, i32) {
    %c0_i32 = arith.constant 0 : i32
    %c0_i32_0 = arith.constant 0 : i32
    return %arg0, %c0_i32, %arg1 : i32, i32, i32
  }
  func.func @transform_2(%arg0: i32, %arg1: i32) -> (i32, i32, i32, i32) {
    %c0_i32 = arith.constant 0 : i32
    %c0_i32_0 = arith.constant 0 : i32
    %c0_i32_1 = arith.constant 0 : i32
    return %arg0, %arg1, %c0_i32, %c0_i32_0 : i32, i32, i32, i32
  }
}

</mosaic_0001>

<bundles_post_ra>
// kernel: tpu_custom_call.1
= control target key start
LH: loop header
LB: loop body
LE: loop exit
PB: predicated region body
PF: predicated region fallthrough
CT: control target
= control target key end

     0   :  { %s868_s0 = inlined_call_operand.hbm [shape: f32[2,4,256], index: 0, kind: input, shape index: {}]   ;;  %s869_s1 = inlined_call_operand.hbm [shape: f32[2,4,256], index: 1, kind: input, shape index: {}]   ;;  %s870_s2 = inlined_call_operand.hbm [shape: f32[2,2,8,128], index: 2, kind: output, shape index: {}]  }
   0x1   :  { %871 = sst [smem:[#allocation11_spill]] %s868_s0 }
   0x2   :  { %7 = vsyncpa [#allocation3], 0 }
   0x3   :  { %9 = vsyncpa [#allocation3 + $0x1], 0 }
   0x4   :  { %10 = vsyncpa [#allocation6], 0 }
   0x5   :  { %12 = vsyncpa [#allocation6 + $0x1], 0 }
   0x6   :  { %13 = vsyncpa [#allocation4], 0 }
   0x7   :  { %15 = vsyncpa [#allocation4 + $0x1], 0  ;;  %s709_s9 = smov 0   ;;  %s711_s10 = smov 0  }
   0x8   :  { %s713_s11 = smov 0   ;;  %s715_s12 = smov 0  }
   0x9   :  { %s717_s13 = smov 0   ;;  %s719_s14 = smov 0  }
   0xa   :  { %s721_s15 = smov 0   ;;  %s723_s16 = smov 0  }
   0xb LB: > { %s422_s17 = sadd.s32 4294967295, %s692_s16   ;;  %s423_s18 = sadd.s32 4294967294, %s692_s16   ;;  %s692_s16 = sphi %s723_s16, %s21_s16   ;;  %s688_s15 = sphi %s721_s15, %s884_s15   ;;  %s684_s14 = sphi %s719_s14, %s883_s14   ;;  %s680_s13 = sphi %s717_s13, %s882_s13   ;;  %s676_s12 = sphi %s715_s12, %s881_s12   ;;  %s672_s11 = sphi %s713_s11, %s880_s11   ;;  %s668_s10 = sphi %s711_s10, %s879_s10   ;;  %s664_s9 = sphi %s709_s9, %s878_s9  }
   0xc   : > { %s30_s19 = sadd.s32 1, %s684_s14  ;;  %s33_s20 = sadd.s32 1, %s688_s15 }
   0xd   : > { %p31_p0 = scmp.ge.s32.totalorder %s30_s19, 2  ;;  %s42_s21 = sadd.s32 1, %s672_s11 }
   0xe   : > { %p49_p1 = scmp.ne.s32.totalorder %s672_s11, %s668_s10  ;;  %p50_p2 = scmp.eq.s32.totalorder %s692_s16, 0 }
   0xf   : > { %s886_s19 = smov (%p31_p0, %s30_s19), 0  ;;  %s888_s20 = smov (!%p31_p0, %s33_s20), %s688_s15 }
  0x10   : > { %s38_s22 = ssub.s32 %s684_s14, %s886_s19  ;;  %p762_p3 = por %p50_p2, %p49_p1 }
  0x11   : > { %p35_p4 = scmp.ge.s32.totalorder %s888_s20, 2  ;;  %p55_p5 = scmp.ne.s32.totalorder %s668_s10, %s664_s9 }
  0x12   : > { %p56_p6 = scmp.eq.s32.totalorder %s422_s17, 0  ;;  %p109_p7 = scmp.eq.s32.totalorder %s422_s17, 3 }
  0x13   : > { %s890_s20 = smov (%p35_p4, %s888_s20), 0  ;;  %p115_p10 = scmp.eq.s32.totalorder %s423_s18, 3 }
  0x14   : > { %p770_p8 = por %p56_p6, %p55_p5  ;;  %p774_p9 = por %p109_p7, %p49_p1 }
  0x15   : > { %s37_s26 = ssub.s32 %s688_s15, %s890_s20  ;;  %p780_p12 = por %p115_p10, %p55_p5 }
  0x16   : > { %s39_s27 = sor.u32 %s38_s22, %s37_s26  ;;  %p460_p13 = scmp.lt.s32.totalorder %s692_s16, 4 }
  0x17   : > { %p40_p11 = scmp.eq.s32.totalorder %s39_s27, 0  ;;  %s135_s29 = sand.u32 1, %s672_s11  }
  0x18   : > { %s426_s3 = sshll.u32 %s135_s29, 2  ;;  %s427_s4 = sshll.u32 %s688_s15, 1 }
  0x19   : > { %s787_s30 = scalar_select %p40_p11, %s672_s11, %s42_s21  }
  0x1a   : > { %s143_s5 = sadd.s32 %s684_s14, %s427_s4  ;;  %s139_s6 = scalar_lea.vmem [#allocation2], %s426_s3 }
  0x1b   : > { %s149_s7 = sshll.u32 %s139_s6, 4  ;;  %s428_s8 = sshll.u32 %s143_s5, 2  ;;  %s150_s7 = int_to_ptr.vmem [resolvable:$true] %s149_s7 }
  0x1c   : > { %s876_s0 = sld [smem:[#allocation11_spill]]  ;;  %p796_p0 = pnand %p460_p13, %p762_p3 }
  0x1d   : > { %p432_p1 = scmp.ge.s32.totalorder %s692_s16, 1  ;;  %s136_s27 = scalar_lea.sflag [#allocation3], %s135_s29 }
  0x1e   : > { %p175_p2 = scmp.lt.s32.totalorder %s692_s16, 5  ;;  %s166_s6 = scalar_lea.hbm %s869_s1, %s428_s8 }
  0x1f   : > { %s168_s17 = sshll.u32 %s166_s6, 4  ;;  %s160_s23 = scalar_lea.vmem [#allocation5], %s426_s3  ;;  %s169_s17 = int_to_ptr.hbm [resolvable:$true] %s168_s17 }
  0x20   : > { %p176_p4 = pnand %p432_p1, %p175_p2  ;;  %s170_s18 = sshll.u32 %s160_s23, 4  ;;  %s171_s18 = int_to_ptr.vmem [resolvable:$true] %s170_s18 }
  0x22   : > { %s145_s22 = scalar_lea.hbm %s876_s0, %s428_s8  ;;  %s157_s0 = scalar_lea.sflag [#allocation6], %s135_s29 }
  0x23   : > { %s147_s21 = sshll.u32 %s145_s22, 4  ;;  %179 = sbr.rel (%p176_p4) target bundleno = 268 (0x10c), region = 28  ;;  %s148_s21 = int_to_ptr.hbm [resolvable:$true] %s147_s21 }
  0x24   : > { %452 = dma.hbm_to_vmem [thread:$0]  (!%p796_p0), %s148_s21, 64, %s150_s7, %s136_s27  }
  0x25   : > { %455 = dma.hbm_to_vmem [thread:$0]  (!%p796_p0), %s169_s17, 64, %s171_s18, %s157_s0  }
  0x26   : > { %s810_s22 = sand.u32 (!%p176_p4), 1, %s668_s10  }
  0x27   : > { %s433_s7 = sshll.u32 (!%p176_p4), %s810_s22, 2  ;;  %s182_s21 = scalar_lea.sflag (!%p176_p4), [#allocation3], %s810_s22 }
  0x28   : > { %s185_s27 = scalar_lea.vmem [#allocation2], %s433_s7 }
  0x29   : > { %651 = dma.done.wait (%p770_p8), %s182_s21, 64  }
  0x2a   : > { %653 = vsyncadd (%p770_p8), %s182_s21, 4294967232  ;;  %s192_s29 = scalar_lea.sflag [#allocation6], %s810_s22  ;;  %s195_s3 = scalar_lea.vmem [#allocation5], %s433_s7 }
  0x2b   : > { %655 = dma.done.wait (%p770_p8), %s192_s29, 64  }
  0x2c   : > { %657 = vsyncadd (%p770_p8), %s192_s29, 4294967232  ;;  %v222_v0 = vld [vmem:[%s185_s27] sm:$0xf]  ;;  %v223_v1 = vld [vmem:[%s195_s3] sm:$0xf]  ;;  %vm225_vm0 = vcmask 1043456   ;;  %v284_v52 = vlaneseq }
  0x2d   : > { %v233_v2 = vmul.f32 %v222_v0, %v222_v0  ;;  %v241_v3 = vmul.f32 %v223_v1, %v223_v1  ;;  %v224_v8 = vmul.f32 %v223_v1, %v222_v0  ;;  %vm273_vm7 = vcmask 1040384   ;;  %s437_s0 = sshll.u32 %s680_s13, 1  ;;  %s435_s8 = sshll.u32 %s810_s22, 3 }
  0x2e   : > { %s305_s24 = sadd.s32 %s676_s12, %s437_s0  ;;  %v285_v53 = vshrl.u32 %v284_v52, 7  ;;  %v287_v54 = vand.u32 127, %v284_v52  ;;  %s221_s17 = scalar_lea.vmem [#allocation7], %s435_s8 }
  0x2f   : > { %v234_v4 = vsel %vm225_vm0, %v233_v2, 0.0  ;;  %v242_v5 = vsel %vm225_vm0, %v241_v3, 0.0  ;;  %v226_v13 = vsel %vm225_vm0, %v224_v8, 0.0  ;;  %s438_s26 = sshll.u32 %s305_s24, 3  ;;  %s309_s23 = sshll.u32 %s221_s17, 4  ;;  %s310_s23 = int_to_ptr.vmem [resolvable:$true] %s309_s23 }
  0x30   : > { %v235_v6 = vrot.slane %v234_v4, 4  ;;  %v243_v7 = vrot.slane %v242_v5, 4  ;;  %v227_v16 = vrot.slane %v226_v13, 4  ;;  %s307_s6 = scalar_lea.hbm %s870_s2, %s438_s26  ;;  %vm288_vm8 = vcmp.eq.s32.totalorder %v285_v53, 0  ;;  %s295_s12 = scalar_lea.sflag [#allocation4], %s810_s22 }
  0x31   : > { %vm289_vm9 = vcmp.eq.s32.totalorder %v287_v54, 0  ;;  %s311_s18 = sshll.u32 %s307_s6, 4  ;;  %s610_s3 = scalar_lea.hbm %s870_s2, 32  ;;  %s312_s18 = int_to_ptr.hbm [resolvable:$true] %s311_s18 }
  0x32   : > { %v236_v9 = vadd.f32 %v235_v6, %v234_v4  ;;  %v244_v10 = vadd.f32 %v243_v7, %v242_v5  ;;  %v228_v21 = vadd.f32 %v227_v16, %v226_v13  ;;  %vm290_vm10 = vmand %vm288_vm8, %vm289_vm9  ;;  %s604_s13 = sshra.s32 %s312_s18, 4  ;;  %s605_s13 = int_to_ptr.hbm [resolvable:$true] %s604_s13 }
  0x33   : > { %s606_s21 = scalar_lea.hbm %s605_s13, 8  ;;  %p611_p7 = scmp.lt.s32.totalorder %s605_s13, %s870_s2 }
  0x34   : > { %v237_v11 = vrot.slane %v236_v9, 2  ;;  %v245_v12 = vrot.slane %v244_v10, 2  ;;  %v229_v24 = vrot.slane %v228_v21, 2  ;;  %p607_p3 = scmp.ne.s32.totalorder %s605_s13, %s606_s21  ;;  %p612_p8 = scmp.lt.s32.totalorder %s610_s3, %s606_s21 }
  0x36   : > { %v238_v14 = vadd.f32 %v237_v11, %v236_v9  ;;  %v246_v15 = vadd.f32 %v245_v12, %v244_v10  ;;  %v230_v26 = vadd.f32 %v229_v24, %v228_v21  ;;  %p608_p5 = pnand %p607_p3, %p774_p9  ;;  %p613_p10 = por %p612_p8, %p611_p7 }
  0x38   : > { %v239_v17 = vrot.slane %v238_v14, 1  ;;  %v247_v18 = vrot.slane %v246_v15, 1  ;;  %v231_v31 = vrot.slane %v230_v26, 1  ;;  %p609_p6 = pneg %p608_p5 }
  0x3a   : > { %v240_v19 = vadd.f32 %v239_v17, %v238_v14  ;;  %v248_v20 = vadd.f32 %v247_v18, %v246_v15  ;;  %v232_v36 = vadd.f32 %v231_v31, %v230_v26  ;;  %p614_p11 = pnand %p613_p10, %p609_p6 }
  0x3c   : > { %v249_v22 = vmax.f32 %v240_v19, 1e-16  ;;  %v261_v23 = vmax.f32 %v248_v20, 1e-16 }
  0x3e   : > { %526 = vrsqrt.f32 %v249_v22  ;;  %vm256_vm1 = vweird.f32 %v249_v22  ;;  %vm268_vm3 = vweird.f32 %v261_v23 }
  0x3f   : > { %528 = vrsqrt.f32 %v261_v23 }
  0x44   : > { %v527_v25 = vpop.eup %526 }
  0x45   : > { %v529_v27 = vpop.eup %528  ;;  %v251_v28 = vmul.f32 %v527_v25, %v249_v22  ;;  %vm257_vm2 = vweird.f32 %v527_v25 }
  0x46   : > { %v263_v29 = vmul.f32 %v529_v27, %v261_v23  ;;  %vm269_vm4 = vweird.f32 %v529_v27  ;;  %vm258_vm5 = vmor %vm256_vm1, %vm257_vm2 }
  0x47   : > { %v252_v30 = vmul.f32 %v527_v25, %v251_v28  ;;  %vm270_vm6 = vmor %vm268_vm3, %vm269_vm4 }
  0x48   : > { %v264_v32 = vmul.f32 %v529_v27, %v263_v29 }
  0x49   : > { %v253_v33 = vmul.f32 0.5, %v252_v30 }
  0x4a   : > { %v265_v34 = vmul.f32 0.5, %v264_v32 }
  0x4b   : > { %v254_v35 = vsub.f32 1.5, %v253_v33 }
  0x4c   : > { %v266_v37 = vsub.f32 1.5, %v265_v34 }
  0x4d   : > { %v255_v38 = vmul.f32 %v527_v25, %v254_v35 }
  0x4e   : > { %v267_v39 = vmul.f32 %v529_v27, %v266_v37 }
  0x4f   : > { %v259_v40 = vsel %vm258_vm5, %v527_v25, %v255_v38 }
  0x50   : > { %v260_v41 = vmul.f32 %v259_v40, %v232_v36  ;;  %v271_v42 = vsel %vm270_vm6, %v529_v27, %v267_v39 }
  0x52   : > { %v272_v43 = vmul.f32 %v271_v42, %v260_v41 }
  0x54   : > { %v274_v44 = vsel %vm273_vm7, %v272_v43, 0.0 }
  0x55   : > { %275 = vadd.xlane.f32.xlu0 %v274_v44 }
  0xc8   : > { %v276_v45 = vpop.xlane.xlu0 %275 }
  0xc9   : > { %v277_v46 = vrot.slane %v276_v45, 4 }
  0xcb   : > { %v278_v47 = vadd.f32 %v277_v46, %v276_v45 }
  0xcd   : > { %v279_v48 = vrot.slane %v278_v47, 2 }
  0xcf   : > { %v280_v49 = vadd.f32 %v279_v48, %v278_v47 }
  0xd1   : > { %v281_v50 = vrot.slane %v280_v49, 1 }
  0xd3   : > { %v282_v51 = vadd.f32 %v281_v50, %v280_v49 }
  0xd5   : > { %441 = vpush %v282_v51 }
 0x106   : > { %s442_s7 = spop %441 }
 0x107   : > { %v291_v55 = vstv %s442_s7 }
 0x108   : > { %v292_v56 = vsel %vm290_vm10, %v291_v55, 0.0 }
 0x109   : > { %293 = vst [vmem:[%s221_s17] sm:$0xff] %v292_v56 }
 0x10a   : > { %617 = shalt.err (!%p614_p11)
}
 0x10b   : > { %447 = dma.vmem_to_hbm [thread:$0]  (%p774_p9), %s310_s23, 128, %s312_s18, %s295_s12  }
 0x10c PF: > { %p461_p13 = scmp.ge.s32.totalorder %s692_s16, 2  ;;  %s323_s22 = sand.u32 1, %s664_s9  }
 0x10d   : > { %s324_s8 = scalar_lea.sflag [#allocation4], %s323_s22 }
 0x10e   : > { %p457_p0 = pnand %p461_p13, %p780_p12 }
 0x110   : > { %p458_p1 = pneg %p457_p0 }
 0x112   : > { %659 = dma.done.wait (%p458_p1), %s324_s8, 128  }
 0x113   : > { %661 = vsyncadd (%p458_p1), %s324_s8, 4294967168  ;;  %s21_s16 = sadd.s32 1, %s692_s16   ;;  %s878_s9 = smov %s668_s10 }
 0x114   : > { %p18_p2 = scmp.ge.s32.totalorder %s21_s16, 6   ;;  %s879_s10 = smov %s672_s11 }
 0x115   : > { %s880_s11 = smov %s787_s30  ;;  %s881_s12 = smov %s684_s14 }
 0x116   : > { %s882_s13 = smov %s688_s15  ;;  %s883_s14 = smov %s886_s19 }
 0x117   : > { %s884_s15 = smov %s890_s20  ;;  %20 = sbr.rel (!%p18_p2) target bundleno = 11 (0xb), region = 86 }
 0x11c   :  { %330 = vsyncpa [#allocation3], 1 }
 0x11d   :  { %332 = vsyncpa [#allocation3 + $0x1], 1 }
 0x11e   :  { %333 = vsyncpa [#allocation6], 1 }
 0x11f   :  { %335 = vsyncpa [#allocation6 + $0x1], 1 }
 0x120   :  { %336 = vsyncpa [#allocation4], 1 }
 0x121   :  { %338 = vsyncpa [#allocation4 + $0x1], 1 }

</bundles_post_ra>
